<compile_context>
chip_gen: v7x
topology: tpu7x:2x2x1
jax: 0.10.0
libtpu: 0.0.40
codegen_flags: <defaults>
</compile_context>

<pallas_src>
import math
import functools

import jax
import jax.numpy as jnp
from jax import lax
from jax.experimental import pallas as pl
from jax.experimental.pallas import tpu as pltpu


def _cita_kernel(q_ref, k_ref, v_ref, m_ref,
                 wq_ref, bq_ref, wk_ref, bk_ref, wo_ref, bo_ref,
                 out_ref, *, compute_dtype):
    Bt, Lq, E = q_ref.shape
    _, Lk, D = v_ref.shape
    Hp = out_ref.shape[-1]
    cd = compute_dtype
    inv_sqrt_dk = jnp.float32(1.0 / math.sqrt(E))  # embed_time_k == E (heads=1)

    # ---- Linear projections: batch-independent, fold Bt into the M dim. ----
    q2 = q_ref[...].reshape(Bt * Lq, E).astype(cd)
    k2 = k_ref[...].reshape(Bt * Lk, E).astype(cd)
    qp = jnp.dot(q2, wq_ref[...].astype(cd),
                 preferred_element_type=jnp.float32) + bq_ref[...]
    kp = jnp.dot(k2, wk_ref[...].astype(cd),
                 preferred_element_type=jnp.float32) + bk_ref[...]
    # Fold the score scale into the (much smaller) q projection.
    qp = qp * inv_sqrt_dk
    qp = qp.reshape(Bt, Lq, E)
    kp = kp.reshape(Bt, Lk, E)

    # ---- Attention scores: contract E on both operands (no kp transpose). ----
    scores = lax.dot_general(
        qp.astype(cd), kp.astype(cd),
        dimension_numbers=(((2,), (2,)), ((0,), (0,))),
        preferred_element_type=jnp.float32)              # (Bt, Lq, Lk)

    # ---- Masked, channel-independent softmax as one fused MXU matmul. ----
    # Row max over the *unmasked* scores; softmax ratios are invariant to the
    # subtracted constant, and exp(-1e9 - max) == 0 in f32 anyway, so masked
    # entries are handled by the multiplicative mask below.
    s_max = jnp.max(scores, axis=2, keepdims=True)       # (Bt, Lq, 1)
    e = jnp.exp(scores - s_max)                          # (Bt, Lq, Lk) f32

    v32 = v_ref[...].astype(jnp.float32)                 # (Bt, Lk, D)
    mf = (m_ref[...] != 0).astype(jnp.float32)           # (Bt, Lk, D)
    # Fused RHS: [mask * value | mask] so numerator and denominator come from a
    # single dot_general (the exp matrix `e` is streamed through the MXU once).
    mvf = jnp.concatenate([mf * v32, mf], axis=-1)       # (Bt, Lk, 2D)

    dn = (((2,), (1,)), ((0,), (0,)))
    nd = lax.dot_general(e.astype(cd), mvf.astype(cd), dn,
                         preferred_element_type=jnp.float32)   # (Bt, Lq, 2D)
    numer = nd[..., :D]
    denom = nd[..., D:]

    # All-keys-masked columns: torch's -1e9 fill degenerates to a uniform
    # distribution over keys -> fall back to mean_k value there.
    x = numer * pl.reciprocal(denom, approx=True)
    v_mean = jnp.mean(v32, axis=1, keepdims=True)        # (Bt, 1, D)
    x = jnp.where(denom > 0.0, x, jnp.broadcast_to(v_mean, x.shape))

    # ---- Output projection; Hp is lane-dense (multiple of 128). ----
    x2 = x.reshape(Bt * Lq, D).astype(cd)
    out = jnp.dot(x2, wo_ref[...].astype(cd),
                  preferred_element_type=jnp.float32) + bo_ref[...]
    out_ref[...] = out.reshape(Bt, Lq, Hp).astype(out_ref.dtype)


def channel_independent_time_attention(query, key, value, mask, params,
                                       *, block_b=None, use_bf16=False):
    """params = (wq_t (E,E), bq (E,), wk_t (E,E), bk (E,), wo_t (D,H), bo (H,)).

    Weights are pre-transposed to (in, out) so the kernel computes x @ W + b.
    use_bf16: cast MXU operands to bf16 (f32 accumulate) -- good on v6e/v7x.
    block_b: batch rows folded into one grid step; default keeps >= 2 grid
             steps (one per v7x TensorCore) while allowing batch folding.
    """
    B, Lq, E = query.shape
    _, Lk, D = value.shape
    wq_t, bq, wk_t, bk, wo_t, bo = params
    H = wo_t.shape[1]

    # Lane-dense output: pad the output feature dim to a multiple of 128 so the
    # final store is an unmasked `vst`; slice the padding off after the call.
    Hp = ((H + 127) // 128) * 128
    wo_p = jnp.zeros((D, Hp), jnp.float32).at[:, :H].set(wo_t.astype(jnp.float32))
    bo_p = jnp.zeros((1, Hp), jnp.float32).at[:, :H].set(bo.astype(jnp.float32))

    bq2 = bq.astype(jnp.float32).reshape(1, E)
    bk2 = bk.astype(jnp.float32).reshape(1, E)

    # Batch grouping: bigger matmul M dim / fewer pipeline steps, but keep the
    # grid >= 2 steps when B >= 2 so both TensorCores get work on v7x.
    if block_b is None:
        block_b = 1 if B <= 1 else max(1, B // 2)
    while B % block_b != 0:
        block_b -= 1
    grid_b = B // block_b

    compute_dtype = jnp.bfloat16 if use_bf16 else jnp.float32
    kernel = functools.partial(_cita_kernel, compute_dtype=compute_dtype)

    out_padded = pl.pallas_call(
        kernel,
        out_shape=jax.ShapeDtypeStruct((B, Lq, Hp), jnp.float32),
        grid_spec=pltpu.PrefetchScalarGridSpec(
            num_scalar_prefetch=0,
            grid=(grid_b,),
            in_specs=[
                pl.BlockSpec((block_b, Lq, E), lambda g: (g, 0, 0)),   # query
                pl.BlockSpec((block_b, Lk, E), lambda g: (g, 0, 0)),   # key
                pl.BlockSpec((block_b, Lk, D), lambda g: (g, 0, 0)),   # value
                pl.BlockSpec((block_b, Lk, D), lambda g: (g, 0, 0)),   # mask
                pl.BlockSpec((E, E), lambda g: (0, 0)),                # W_q^T
                pl.BlockSpec((1, E), lambda g: (0, 0)),                # b_q
                pl.BlockSpec((E, E), lambda g: (0, 0)),                # W_k^T
                pl.BlockSpec((1, E), lambda g: (0, 0)),                # b_k
                pl.BlockSpec((D, Hp), lambda g: (0, 0)),               # W_out^T (padded)
                pl.BlockSpec((1, Hp), lambda g: (0, 0)),               # b_out   (padded)
            ],
            out_specs=pl.BlockSpec((block_b, Lq, Hp), lambda g: (g, 0, 0)),
        ),
        compiler_params=pltpu.CompilerParams(
            dimension_semantics=("parallel",)),
    )(query, key, value, mask, wq_t, bq2, wk_t, bk2, wo_p, bo_p)

    return out_padded[..., :H]


def reference(query, key, value, mask, params):
    """Pure-JAX reference mirroring the PyTorch forward."""
    wq_t, bq, wk_t, bk, wo_t, bo = params
    qp = query @ wq_t + bq
    kp = key @ wk_t + bk
    d_k = qp.shape[-1]
    scores = jnp.einsum('bqe,bke->bqk', qp, kp) / math.sqrt(d_k)
    s = jnp.where(mask[:, None, :, :] == 0, -1e9, scores[..., None])
    p = jax.nn.softmax(s, axis=-2)
    x = jnp.sum(p * value[:, None, :, :], axis=-2)
    return x @ wo_t + bo


if __name__ == "__main__":
    # Small shapes consistent with the module: batch=2, seq=8, input_dim=4,
    # embed_time=16, nhidden=32, num_heads=1.
    B, Lq, Lk, D, E, H = 2, 8, 8, 4, 16, 32

    root = jax.random.PRNGKey(0)
    ks = jax.random.split(root, 8)

    query = jax.random.normal(ks[0], (B, Lq, E), jnp.float32)
    key_in = jax.random.normal(ks[1], (B, Lk, E), jnp.float32)
    value = jax.random.normal(ks[2], (B, Lk, D), jnp.float32)
    mask = (jax.random.uniform(ks[3], (B, Lk, D)) > 0.3).astype(jnp.float32)

    def lin_init(k, fan_in, fan_out):
        # Deterministic PyTorch-Linear-style uniform init.
        kw, kb = jax.random.split(k)
        bound = 1.0 / math.sqrt(fan_in)
        w = jax.random.uniform(kw, (fan_out, fan_in), jnp.float32, -bound, bound)
        b = jax.random.uniform(kb, (fan_out,), jnp.float32, -bound, bound)
        return w, b

    wq, bq = lin_init(ks[4], E, E)   # Linear(embed_time, embed_time)
    wk, bk = lin_init(ks[5], E, E)   # Linear(embed_time, embed_time)
    wo, bo = lin_init(ks[6], D, H)   # Linear(input_dim * num_heads, nhidden)

    # Pre-transpose weights to (in, out) so the kernel does x @ W_t + b.
    params = (wq.T, bq, wk.T, bk, wo.T, bo)

    ref = reference(query, key_in, value, mask, params)

    # f32 MXU operands (v5e-friendly); approx reciprocal on the EUP.
    out = channel_independent_time_attention(query, key_in, value, mask, params)
    out = jax.block_until_ready(out)
    assert out.shape == (B, Lq, H)
    assert bool(jnp.allclose(out, ref, atol=1e-2, rtol=1e-2)), \
        "f32 kernel/reference mismatch"

    # bf16 MXU operands (full-rate MXU on v6e/v7x); softmax math stays f32.
    out_bf16 = channel_independent_time_attention(
        query, key_in, value, mask, params, use_bf16=True)
    out_bf16 = jax.block_until_ready(out_bf16)
    assert bool(jnp.allclose(out_bf16, ref, atol=1e-1, rtol=1e-1)), \
        "bf16 kernel/reference mismatch"

    print("KERNEL_OK")
</pallas_src>

<mosaic_0001>
module attributes {stable_mosaic.version = 11 : i64} {
  func.func @_cita_kernel(%arg0: i32, %arg1: memref<1x8x16xf32, #tpu.memory_space<vmem>>, %arg2: memref<1x8x16xf32, #tpu.memory_space<vmem>>, %arg3: memref<1x8x4xf32, #tpu.memory_space<vmem>>, %arg4: memref<1x8x4xf32, #tpu.memory_space<vmem>>, %arg5: memref<16x16xf32, #tpu.memory_space<vmem>>, %arg6: memref<1x16xf32, #tpu.memory_space<vmem>>, %arg7: memref<16x16xf32, #tpu.memory_space<vmem>>, %arg8: memref<1x16xf32, #tpu.memory_space<vmem>>, %arg9: memref<4x128xf32, #tpu.memory_space<vmem>>, %arg10: memref<1x128xf32, #tpu.memory_space<vmem>>, %arg11: memref<1x8x128xf32, #tpu.memory_space<vmem>>) attributes {dimension_semantics = [#tpu.dimension_semantics<parallel>], iteration_bounds = array<i64: 2>, scalar_prefetch = 0 : i64, scratch_operands = 0 : i64, tpu.core_type = #tpu.core_type<tc>, window_params = [{transform_indices = @transform_0, window_bounds = array<i64: 1, 8, 16>}, {transform_indices = @transform_1, window_bounds = array<i64: 1, 8, 16>}, {transform_indices = @transform_2, window_bounds = array<i64: 1, 8, 4>}, {transform_indices = @transform_3, window_bounds = array<i64: 1, 8, 4>}, {pipeline_mode = #tpu.pipeline_mode<synchronous>, transform_indices = @transform_4, window_bounds = array<i64: 16, 16>}, {pipeline_mode = #tpu.pipeline_mode<synchronous>, transform_indices = @transform_5, window_bounds = array<i64: 1, 16>}, {pipeline_mode = #tpu.pipeline_mode<synchronous>, transform_indices = @transform_6, window_bounds = array<i64: 16, 16>}, {pipeline_mode = #tpu.pipeline_mode<synchronous>, transform_indices = @transform_7, window_bounds = array<i64: 1, 16>}, {pipeline_mode = #tpu.pipeline_mode<synchronous>, transform_indices = @transform_8, window_bounds = array<i64: 4, 128>}, {pipeline_mode = #tpu.pipeline_mode<synchronous>, transform_indices = @transform_9, window_bounds = array<i64: 1, 128>}, {transform_indices = @transform_10, window_bounds = array<i64: 1, 8, 128>}]} {
    %c0 = arith.constant 0 : index
    %c0_0 = arith.constant 0 : index
    %c0_1 = arith.constant 0 : index
    %0 = vector.load %arg1[%c0, %c0_0, %c0_1] : memref<1x8x16xf32, #tpu.memory_space<vmem>>, vector<1x8x16xf32>
    %1 = vector.shape_cast %0 : vector<1x8x16xf32> to vector<8x16xf32>
    %c0_2 = arith.constant 0 : index
    %c0_3 = arith.constant 0 : index
    %c0_4 = arith.constant 0 : index
    %2 = vector.load %arg2[%c0_2, %c0_3, %c0_4] : memref<1x8x16xf32, #tpu.memory_space<vmem>>, vector<1x8x16xf32>
    %3 = vector.shape_cast %2 : vector<1x8x16xf32> to vector<8x16xf32>
    %c0_5 = arith.constant 0 : index
    %c0_6 = arith.constant 0 : index
    %4 = vector.load %arg5[%c0_5, %c0_6] : memref<16x16xf32, #tpu.memory_space<vmem>>, vector<16x16xf32>
    %cst = arith.constant dense<0.000000e+00> : vector<8x16xf32>
    %5 = tpu.matmul %1, %4, %cst {dimension_numbers = #tpu.dot_dimension_numbers<[1], [0], [0], [1], [0, 0, 1, 1], [], []>} : vector<8x16xf32>, vector<16x16xf32>, vector<8x16xf32> -> vector<8x16xf32>
    %c0_7 = arith.constant 0 : index
    %c0_8 = arith.constant 0 : index
    %6 = vector.load %arg6[%c0_7, %c0_8] : memref<1x16xf32, #tpu.memory_space<vmem>>, vector<1x16xf32>
    %7 = vector.broadcast %6 : vector<1x16xf32> to vector<8x16xf32>
    %8 = arith.addf %5, %7 : vector<8x16xf32>
    %c0_9 = arith.constant 0 : index
    %c0_10 = arith.constant 0 : index
    %9 = vector.load %arg7[%c0_9, %c0_10] : memref<16x16xf32, #tpu.memory_space<vmem>>, vector<16x16xf32>
    %cst_11 = arith.constant dense<0.000000e+00> : vector<8x16xf32>
    %10 = tpu.matmul %3, %9, %cst_11 {dimension_numbers = #tpu.dot_dimension_numbers<[1], [0], [0], [1], [0, 0, 1, 1], [], []>} : vector<8x16xf32>, vector<16x16xf32>, vector<8x16xf32> -> vector<8x16xf32>
    %c0_12 = arith.constant 0 : index
    %c0_13 = arith.constant 0 : index
    %11 = vector.load %arg8[%c0_12, %c0_13] : memref<1x16xf32, #tpu.memory_space<vmem>>, vector<1x16xf32>
    %12 = vector.broadcast %11 : vector<1x16xf32> to vector<8x16xf32>
    %13 = arith.addf %10, %12 : vector<8x16xf32>
    %cst_14 = arith.constant 2.500000e-01 : f32
    %14 = vector.broadcast %cst_14 : f32 to vector<8x16xf32>
    %15 = arith.mulf %8, %14 : vector<8x16xf32>
    %16 = vector.shape_cast %15 : vector<8x16xf32> to vector<1x8x16xf32>
    %17 = vector.shape_cast %13 : vector<8x16xf32> to vector<1x8x16xf32>
    %cst_15 = arith.constant dense<0.000000e+00> : vector<1x8x8xf32>
    %18 = tpu.matmul %16, %17, %cst_15 {dimension_numbers = #tpu.dot_dimension_numbers<[2], [2], [1], [1], [0, 0, 0, 1, 1, 1], [0], [0]>} : vector<1x8x16xf32>, vector<1x8x16xf32>, vector<1x8x8xf32> -> vector<1x8x8xf32>
    %cst_16 = arith.constant dense<0xFF800000> : vector<1x8xf32>
    %19 = vector.multi_reduction <maximumf>, %18, %cst_16 [2] : vector<1x8x8xf32> to vector<1x8xf32>
    %20 = vector.shape_cast %19 : vector<1x8xf32> to vector<1x8x1xf32>
    %21 = vector.broadcast %20 : vector<1x8x1xf32> to vector<1x8x8xf32>
    %22 = arith.subf %18, %21 : vector<1x8x8xf32>
    %23 = math.exp %22 : vector<1x8x8xf32>
    %c0_17 = arith.constant 0 : index
    %c0_18 = arith.constant 0 : index
    %c0_19 = arith.constant 0 : index
    %24 = vector.load %arg3[%c0_17, %c0_18, %c0_19] : memref<1x8x4xf32, #tpu.memory_space<vmem>>, vector<1x8x4xf32>
    %c0_20 = arith.constant 0 : index
    %c0_21 = arith.constant 0 : index
    %c0_22 = arith.constant 0 : index
    %25 = vector.load %arg4[%c0_20, %c0_21, %c0_22] : memref<1x8x4xf32, #tpu.memory_space<vmem>>, vector<1x8x4xf32>
    %cst_23 = arith.constant 0.000000e+00 : f32
    %26 = vector.broadcast %cst_23 : f32 to vector<1x8x4xf32>
    %27 = arith.cmpf one, %25, %26 : vector<1x8x4xf32>
    %28 = arith.extui %27 : vector<1x8x4xi1> to vector<1x8x4xi32>
    %29 = arith.sitofp %28 : vector<1x8x4xi32> to vector<1x8x4xf32>
    %30 = arith.mulf %29, %24 : vector<1x8x4xf32>
    %31 = tpu.concatenate %30, %29 in 2 : vector<1x8x4xf32>, vector<1x8x4xf32> -> vector<1x8x8xf32>
    %cst_24 = arith.constant dense<0.000000e+00> : vector<1x8x8xf32>
    %32 = tpu.matmul %23, %31, %cst_24 {dimension_numbers = #tpu.dot_dimension_numbers<[2], [1], [1], [2], [0, 0, 0, 1, 1, 2], [0], [0]>} : vector<1x8x8xf32>, vector<1x8x8xf32>, vector<1x8x8xf32> -> vector<1x8x8xf32>
    %33 = vector.extract_strided_slice %32 {offsets = [0, 0, 0], sizes = [1, 8, 4], strides = [1, 1, 1]} : vector<1x8x8xf32> to vector<1x8x4xf32>
    %34 = vector.extract_strided_slice %32 {offsets = [0, 0, 4], sizes = [1, 8, 4], strides = [1, 1, 1]} : vector<1x8x8xf32> to vector<1x8x4xf32>
    %35 = tpu.reciprocal %34 {approx = true} : vector<1x8x4xf32> -> vector<1x8x4xf32>
    %36 = arith.mulf %33, %35 : vector<1x8x4xf32>
    %cst_25 = arith.constant dense<0.000000e+00> : vector<1x4xf32>
    %37 = vector.multi_reduction <add>, %24, %cst_25 [1] : vector<1x8x4xf32> to vector<1x4xf32>
    %38 = vector.shape_cast %37 : vector<1x4xf32> to vector<1x1x4xf32>
    %cst_26 = arith.constant 8.000000e+00 : f32
    %39 = vector.broadcast %cst_26 : f32 to vector<1x1x4xf32>
    %40 = arith.divf %38, %39 : vector<1x1x4xf32>
    %cst_27 = arith.constant 0.000000e+00 : f32
    %41 = vector.broadcast %cst_27 : f32 to vector<1x8x4xf32>
    %42 = arith.cmpf ogt, %34, %41 : vector<1x8x4xf32>
    %43 = vector.shape_cast %40 : vector<1x1x4xf32> to vector<1x1x4xf32>
    %44 = vector.broadcast %43 : vector<1x1x4xf32> to vector<1x8x4xf32>
    %45 = arith.select %42, %36, %44 : vector<1x8x4xi1>, vector<1x8x4xf32>
    %46 = vector.shape_cast %45 : vector<1x8x4xf32> to vector<8x4xf32>
    %c0_28 = arith.constant 0 : index
    %c0_29 = arith.constant 0 : index
    %47 = vector.load %arg9[%c0_28, %c0_29] : memref<4x128xf32, #tpu.memory_space<vmem>>, vector<4x128xf32>
    %cst_30 = arith.constant dense<0.000000e+00> : vector<8x128xf32>
    %48 = tpu.matmul %46, %47, %cst_30 {dimension_numbers = #tpu.dot_dimension_numbers<[1], [0], [0], [1], [0, 0, 1, 1], [], []>} : vector<8x4xf32>, vector<4x128xf32>, vector<8x128xf32> -> vector<8x128xf32>
    %c0_31 = arith.constant 0 : index
    %c0_32 = arith.constant 0 : index
    %49 = vector.load %arg10[%c0_31, %c0_32] : memref<1x128xf32, #tpu.memory_space<vmem>>, vector<1x128xf32>
    %50 = vector.broadcast %49 : vector<1x128xf32> to vector<8x128xf32>
    %51 = arith.addf %48, %50 : vector<8x128xf32>
    %52 = vector.shape_cast %51 : vector<8x128xf32> to vector<1x8x128xf32>
    %c0_33 = arith.constant 0 : index
    %c0_34 = arith.constant 0 : index
    %c0_35 = arith.constant 0 : index
    %53 = vector.load %arg11[%c0_33, %c0_34, %c0_35] : memref<1x8x128xf32, #tpu.memory_space<vmem>>, vector<1x8x128xf32>
    tpu.vector_store %arg11[%c0_33, %c0_34, %c0_35], %52 {strides = array<i32>} : memref<1x8x128xf32, #tpu.memory_space<vmem>>, vector<1x8x128xf32>,
    return
  }
  func.func @transform_0(%arg0: i32) -> (i32, i32, i32) {
    %c0_i32 = arith.constant 0 : i32
    %c0_i32_0 = arith.constant 0 : i32
    %c0_i32_1 = arith.constant 0 : i32
    return %arg0, %c0_i32, %c0_i32_0 : i32, i32, i32
  }
  func.func @transform_1(%arg0: i32) -> (i32, i32, i32) {
    %c0_i32 = arith.constant 0 : i32
    %c0_i32_0 = arith.constant 0 : i32
    %c0_i32_1 = arith.constant 0 : i32
    return %arg0, %c0_i32, %c0_i32_0 : i32, i32, i32
  }
  func.func @transform_2(%arg0: i32) -> (i32, i32, i32) {
    %c0_i32 = arith.constant 0 : i32
    %c0_i32_0 = arith.constant 0 : i32
    %c0_i32_1 = arith.constant 0 : i32
    return %arg0, %c0_i32, %c0_i32_0 : i32, i32, i32
  }
  func.func @transform_3(%arg0: i32) -> (i32, i32, i32) {
    %c0_i32 = arith.constant 0 : i32
    %c0_i32_0 = arith.constant 0 : i32
    %c0_i32_1 = arith.constant 0 : i32
    return %arg0, %c0_i32, %c0_i32_0 : i32, i32, i32
  }
  func.func @transform_4(%arg0: i32) -> (i32, i32) {
    %c0_i32 = arith.constant 0 : i32
    %c0_i32_0 = arith.constant 0 : i32
    %c0_i32_1 = arith.constant 0 : i32
    return %c0_i32, %c0_i32_0 : i32, i32
  }
  func.func @transform_5(%arg0: i32) -> (i32, i32) {
    %c0_i32 = arith.constant 0 : i32
    %c0_i32_0 = arith.constant 0 : i32
    %c0_i32_1 = arith.constant 0 : i32
    return %c0_i32, %c0_i32_0 : i32, i32
  }
  func.func @transform_6(%arg0: i32) -> (i32, i32) {
    %c0_i32 = arith.constant 0 : i32
    %c0_i32_0 = arith.constant 0 : i32
    %c0_i32_1 = arith.constant 0 : i32
    return %c0_i32, %c0_i32_0 : i32, i32
  }
  func.func @transform_7(%arg0: i32) -> (i32, i32) {
    %c0_i32 = arith.constant 0 : i32
    %c0_i32_0 = arith.constant 0 : i32
    %c0_i32_1 = arith.constant 0 : i32
    return %c0_i32, %c0_i32_0 : i32, i32
  }
  func.func @transform_8(%arg0: i32) -> (i32, i32) {
    %c0_i32 = arith.constant 0 : i32
    %c0_i32_0 = arith.constant 0 : i32
    %c0_i32_1 = arith.constant 0 : i32
    return %c0_i32, %c0_i32_0 : i32, i32
  }
  func.func @transform_9(%arg0: i32) -> (i32, i32) {
    %c0_i32 = arith.constant 0 : i32
    %c0_i32_0 = arith.constant 0 : i32
    %c0_i32_1 = arith.constant 0 : i32
    return %c0_i32, %c0_i32_0 : i32, i32
  }
  func.func @transform_10(%arg0: i32) -> (i32, i32, i32) {
    %c0_i32 = arith.constant 0 : i32
    %c0_i32_0 = arith.constant 0 : i32
    %c0_i32_1 = arith.constant 0 : i32
    return %arg0, %c0_i32, %c0_i32_0 : i32, i32, i32
  }
}

</mosaic_0001>

<bundles_post_ra>
// kernel: tpu_custom_call.1
= control target key start
LH: loop header
LB: loop body
LE: loop exit
PB: predicated region body
PF: predicated region fallthrough
CT: control target
= control target key end

     0   :  { %15 = vsyncpa [#allocation3], 0  ;;  %s1364_s0 = inlined_call_operand.vmem [shape: f32[2,8,16], index: 0, kind: input, shape index: {}]   ;;  %s1365_s1 = inlined_call_operand.vmem [shape: f32[2,8,16], index: 1, kind: input, shape index: {}]   ;;  %s1366_s2 = inlined_call_operand.vmem [shape: f32[2,8,4], index: 2, kind: input, shape index: {}]   ;;  %s1367_s3 = inlined_call_operand.vmem [shape: f32[2,8,4], index: 3, kind: input, shape index: {}]   ;;  %s1368_s4 = inlined_call_operand.vmem [shape: f32[16,16], index: 4, kind: input, shape index: {}]   ;;  %s1369_s5 = inlined_call_operand.vmem [shape: f32[1,16], index: 5, kind: input, shape index: {}]   ;;  %s1370_s6 = inlined_call_operand.vmem [shape: f32[16,16], index: 6, kind: input, shape index: {}]   ;;  %s1371_s7 = inlined_call_operand.vmem [shape: f32[1,16], index: 7, kind: input, shape index: {}]   ;;  %s1372_s8 = inlined_call_operand.vmem [shape: f32[4,128], index: 8, kind: input, shape index: {}]   ;;  %s1373_s9 = inlined_call_operand.vmem [shape: f32[1,128], index: 9, kind: input, shape index: {}]   ;;  %s1374_s10 = inlined_call_operand.hbm [shape: f32[2,8,128], index: 10, kind: output, shape index: {}]  }
   0x1   :  { %17 = vsyncpa [#allocation3 + $0x1], 0  ;;  %s1208_s13 = smov 0   ;;  %s1210_s14 = smov 0  }
   0x2   :  { %s1212_s15 = smov 0   ;;  %s1214_s16 = smov 0  }
   0x3 LB: > { %s1229_s17 = sadd.s32 4294967295, %s1145_s16   ;;  %s964_s18 = sadd.s32 4294967294, %s1145_s16   ;;  %s1145_s16 = sphi %s1214_s16, %s1380_s16   ;;  %s1141_s15 = sphi %s1212_s15, %s1379_s15   ;;  %s1137_s14 = sphi %s1210_s14, %s1378_s14   ;;  %s1133_s13 = sphi %s1208_s13, %s1377_s13  }
   0x4   : > { %s1233_s19 = sadd.s32 1, %s1145_s16   ;;  %s260_s20 = sadd.s32 1, %s1141_s15 }
   0x5   : > { %s257_s21 = ssub.s32 %s1145_s16, %s1233_s19  ;;  %p270_p0 = scmp.ne.s32.totalorder %s1141_s15, %s1137_s14 }
   0x6   : > { %p258_p1 = scmp.eq.s32.totalorder %s257_s21, 0  ;;  %p271_p2 = scmp.eq.s32.totalorder %s1229_s17, 1 }
   0x7   : > { %p276_p3 = scmp.ne.s32.totalorder %s1137_s14, %s1133_s13  ;;  %p277_p4 = scmp.eq.s32.totalorder %s964_s18, 1 }
   0x8   : > { %s1244_s22 = scalar_select %p258_p1, %s1141_s15, %s260_s20  }
   0x9   : > { %p1246_p5 = por %p271_p2, %p270_p0  ;;  %p1250_p6 = por %p277_p4, %p276_p3 }
   0xa   : > { %p967_p7 = scmp.ge.s32.totalorder %s1145_s16, 1  ;;  %p341_p8 = scmp.lt.s32.totalorder %s1145_s16, 3 }
   0xc   : > { %p342_p9 = pnand %p967_p7, %p341_p8 }
   0xd   : > { %v491_v0 = vld [vmem:[%s1370_s6] sm:$0xff] (!%p342_p9)  ;;  %v492_v1 = vld [vmem:[%s1370_s6 + $0x8] sm:$0xff] (!%p342_p9)  ;;  %v1147_v3 = vmov (!%p342_p9), 0.0|0.0   ;;  %p390_p10 = scmp.lt.s32.totalorder (!%p342_p9), %s1229_s17, 1  ;;  %vm1148_vm0 = vmmov (!%p342_p9), 0   ;;  %v1149_v7 = vmov (!%p342_p9), 0.0  }
   0xe   : > { %345 = sbr.rel (%p342_p9) target bundleno = 1416 (0x588), region = 60  ;;  %v408_v2 = vld [vmem:[%s1368_s4] sm:$0xff] (!%p342_p9)  ;;  %1032 = vmatprep.subr.bf16.mxu1 (!%p342_p9), %v1147_v3  ;;  %1029 = vmatprep.subr.bf16.mxu0 (!%p342_p9), %v1147_v3  ;;  %v1033_v4 = vpack.c.bf16 (!%p342_p9), %v492_v1, %v491_v0  ;;  %v409_v5 = vld [vmem:[%s1368_s4 + $0x8] sm:$0xff] (!%p342_p9)  ;;  %vm417_vm1 = vcmask (!%p342_p9), 130048   ;;  %vm650_vm2 = vcmask (!%p342_p9), 64512   ;;  %s1150_s27 = smov (!%p342_p9), 4  }
   0xf   : > { %v1030_v6 = vpack.c.bf16 (!%p342_p9), %v409_v5, %v408_v2  ;;  %1011 = vmatprep.mubr.msk.f32.mxu1 (!%p342_p9), %vm1148_vm0, %v1149_v7  ;;  %1004 = vmatprep.mubr.msk.f32.mxu0 (!%p342_p9), %vm1148_vm0, %v1149_v7  ;;  %v975_v10 = vld [vmem:[%s1371_s7] ss:$0 sm:$0xff] (!%p342_p9)  ;;  %vm667_vm4 = vcmask (!%p342_p9), 31744   ;;  %s1151_s11 = smov (!%p342_p9), 124   ;;  %vm780_vm5 = vcmask (!%p342_p9), 1043456   ;;  %s985_s28 = sshll.u32 (!%p342_p9), %s1229_s17, 7 }
  0x10   : > { %1034 = vmatpush3.bf16.msra.mxu1 (!%p342_p9), %v1033_v4  ;;  %v973_v11 = vld [vmem:[%s1369_s5] ss:$0 sm:$0xff] (!%p342_p9) }
  0x11   : > { %1031 = vmatpush3.bf16.msra.mxu0 (!%p342_p9), %v1030_v6  ;;  %1019 = vmatprep.subr.mxu1 (!%p342_p9), %v1149_v7  ;;  %v767_v41 = vld [vmem:[%s1372_s8] sm:$0xf] (!%p342_p9) }
  0x12   : > { %1014 = vmatprep.subr.mxu0 (!%p342_p9), %v1149_v7  ;;  %v981_v50 = vld [vmem:[%s1373_s9] ss:$0 sm:$0xff] (!%p342_p9) }
  0x15   : > { %s391_s18 = scalar_select %p390_p10, %s1229_s17, 1 }
  0x16   : > { %s1152_s17 = smov [#allocation2]  }
  0x17   : > { %s1272_s20 = sshll.u32 %s391_s18, 3  ;;  %s387_s18 = sand.u32 1, %s1137_s14  }
  0x18   : > { %s397_s26 = scalar_lea.vmem %s1365_s1, %s1272_s20  ;;  %s393_s29 = scalar_lea.vmem %s1364_s0, %s1272_s20 }
  0x19   : > { %v407_v8 = vld [vmem:[%s397_s26] sm:$0xff]  ;;  %s405_s26 = scalar_lea.vmem %s1367_s3, %s1272_s20  ;;  %s401_s30 = scalar_lea.vmem %s1366_s2, %s1272_s20 }
  0x1a   : > { %v406_v9 = vld [vmem:[%s393_s29] sm:$0xff]  ;;  %1012 = vmatmul.mubr.msk.f32.vlgmr.msra.gmra.mrb[0].mxu1 %vm417_vm1, %v407_v8  ;;  %s968_s21 = sshll.u32 %s387_s18, 3  ;;  %s856_s12 = scalar_lea.sflag [#allocation3], %s387_s18 }
  0x1b   : > { %1005 = vmatmul.mubr.msk.f32.vlgmr.msra.gmra.mrb[0].mxu0 %vm417_vm1, %v406_v9  ;;  %1021 = vmatprep.mubr.msk.f32.mxu1 %vm1148_vm0, %v1149_v7  ;;  %v658_v22 = vld [vmem:[%s405_s26] sm:$0xff]  ;;  %s389_s29 = scalar_lea.vmem [#allocation2], %s968_s21  ;;  %s1087_s21 = sshll.u32 %s1152_s17, 4  ;;  %s1088_s21 = int_to_ptr.vmem [resolvable:$false] %s1087_s21 }
  0x1c   : > { %1016 = vmatprep.mubr.msk.f32.mxu0 %vm1148_vm0, %v1149_v7  ;;  %vm659_vm3 = vcmp.ne.f32.partialorder %v658_v22, 0.0  ;;  %v657_v24 = vld [vmem:[%s401_s30] sm:$0xff]  ;;  %s869_s30 = sshll.u32 %s389_s29, 4  ;;  %s1089_s26 = scalar_lea.vmem %s1088_s21, 256  ;;  %s1324_s30 = int_to_ptr.vmem [resolvable:$true] %s869_s30 }
  0x1d   : > { %v979_v23 = vsel %vm659_vm3, 1.0, %v1149_v7  ;;  %v748_v35 = vsel %vm667_vm4, %v657_v24, 0.0  ;;  %s1083_s25 = scalar_lea.vmem %s1324_s30, 128  ;;  %p1090_p0 = scmp.lt.s32.totalorder %s1324_s30, %s1088_s21 }
  0x1e   : > { %v662_v26 = vmul.f32 %v979_v23, %v657_v24  ;;  %v749_v36 = vrot.slane %v748_v35, 4  ;;  %p1084_p11 = scmp.ne.s32.totalorder %s1324_s30, %s1083_s25  ;;  %p1091_p1 = scmp.lt.s32.totalorder %s1089_s26, %s1083_s25 }
  0x20   : > { %v750_v37 = vadd.f32 %v749_v36, %v748_v35  ;;  %p1085_p12 = pnand %p1084_p11, %p1246_p5  ;;  %p1092_p2 = por %p1091_p1, %p1090_p0 }
  0x22   : > { %v751_v38 = vrot.slane %v750_v37, 2  ;;  %p1086_p13 = pneg %p1085_p12 }
  0x24   : > { %v752_v39 = vadd.f32 %v751_v38, %v750_v37  ;;  %p1093_p3 = pnand %p1092_p2, %p1086_p13 }
  0x26   : > { %v753_v40 = vrot.slane %v752_v39, 1 }
  0x28   : > { %v754_v42 = vadd.f32 %v753_v40, %v752_v39 }
  0x2a   : > { %v756_v45 = vmul.f32 0.125, %v754_v42 }
  0xed   : > { %v569_v12 = vpop.f32.mrb[0].mxu1 }
  0xee   : > { %v487_v13 = vpop.f32.mrb[0].mxu0  ;;  %v570_v14 = vadd.f32 %v975_v10, %v569_v12  ;;  %v1013_v16 = vpop.f32.mrb[1].mxu1 }
  0xef   : > { %v488_v15 = vadd.f32 %v973_v11, %v487_v13  ;;  %v1006_v17 = vpop.f32.mrb[1].mxu0 }
  0xf0   : > { %1015 = vmatpush3.xpose.msk.msra.mxu0 %vm417_vm1, %v570_v14 }
  0xf1   : > { %v573_v18 = vmul.f32 0.25, %v488_v15  ;;  %1024 = vmatprep.subr.mxu0 %v1149_v7 }
  0xf3   : > { %1017 = vmatmul.mubr.msk.f32.vlgmr.msra.gmra.mrb[2].mxu0 %vm417_vm1, %v573_v18 }
  0xf4   : > { %1026 = vmatprep.mubr.msk.f32.mxu0 %vm1148_vm0, %v1149_v7  ;;  %1025 = vmatpush3.msk.msra.mxu0 %vm780_vm5, %v767_v41 }
 0x1c6   : > { %v646_v19 = vpop.f32.mrb[2].mxu0 }
 0x1c7   : > { %v1018_v20 = vpop.f32.mrb[3].mxu0  ;;  %v651_v21 = vsel %vm650_vm2, %v646_v19, -inf }
 0x1c8   : > { %652 = vmax.xlane.f32.xlu0 %v651_v21 }
 0x1de   : > { %664 = vrot.lane.b32.xlu0 %v979_v23, %s1150_s27 }
 0x255   : > { %v653_v25 = vpop.xlane.xlu0 %652 }
 0x256   : > { %v654_v27 = vsub.f32 %v646_v19, %v653_v25 }
 0x258   : > { %v655_v28 = vmul.f32 1.442695, %v654_v27 }
 0x259   : > { %v665_v29 = vpop.permute.xlu0 %664 }
 0x25a   : > { %1079 = vpow2.f32 %v655_v28  ;;  %v668_v30 = vsel %vm667_vm4, %v662_v26, %v665_v29 }
 0x25b   : > { %1020 = vmatpush3.msra.mxu1 %v668_v30 }
 0x264   : > { %v1080_v31 = vpop.eup %1079 }
 0x265   : > { %1022 = vmatmul.mubr.msk.f32.vlgmr.msra.gmra.mrb[2].mxu1 %vm650_vm2, %v1080_v31 }
 0x338   : > { %v738_v32 = vpop.f32.mrb[2].mxu1 }
 0x339   : > { %1081 = vrcp.f32 %v738_v32  ;;  %v1023_v33 = vpop.f32.mrb[3].mxu1  ;;  %vm757_vm6 = vcmp.gt.f32.partialorder %v738_v32, 0.0 }
 0x343   : > { %v1082_v34 = vpop.eup %1081 }
 0x344   : > { %744 = vrot.lane.b32.xlu1 %v1082_v34, %s1151_s11 }
 0x3b6   : > { %v745_v43 = vpop.permute.xlu1 %744 }
 0x3b7   : > { %v747_v44 = vmul.f32 %v745_v43, %v738_v32 }
 0x3b9   : > { %759 = vrot.lane.b32.xlu1 %v747_v44, %s1150_s27 }
 0x3bd   : > { %763 = vrot.lane.b32.xlu1 %v756_v45, %s1150_s27 }
 0x42b   : > { %v760_v46 = vpop.permute.xlu1 %759 }
 0x42f   : > { %v764_v47 = vpop.permute.xlu1 %763 }
 0x430   : > { %v766_v48 = vsel %vm757_vm6, %v760_v46, %v764_v47 }
 0x431   : > { %776 = vrot.lane.b32.xlu1 %v766_v48, %s1151_s11  ;;  %s1322_s11 = scalar_lea.hbm %s1374_s10, %s985_s28 }
 0x4a3   : > { %v777_v49 = vpop.permute.xlu1 %776 }
 0x4a4   : > { %1027 = vmatmul.mubr.msk.f32.vlgmr.msra.gmra.mrb[4].mxu0 %vm667_vm4, %v777_v49 }
 0x577   : > { %v850_v51 = vpop.f32.mrb[4].mxu0 }
 0x578   : > { %v851_v52 = vadd.f32 %v981_v50, %v850_v51  ;;  %v1028_v53 = vpop.f32.mrb[5].mxu0 }
 0x57a   : > { %854 = vst [vmem:[%s389_s29] sm:$0xff] %v851_v52 }
 0x57b   : > { %1096 = shalt.err (!%p1093_p3)
}
 0x57c   : > { %s1097_s18 = scalar_lea.hbm %s1322_s11, 128  ;;  %s1101_s27 = scalar_lea.hbm %s1374_s10, 256 }
 0x57d   : > { %p1098_p4 = scmp.ne.s32.totalorder %s1322_s11, %s1097_s18  ;;  %p1102_p9 = scmp.lt.u32.totalorder %s1322_s11, %s1374_s10 }
 0x57e   : > { %p1103_p10 = scmp.lt.u32.totalorder %s1101_s27, %s1097_s18  ;;  %p1105_p12 = scmp.lt.u32.totalorder %s1097_s18, %s1322_s11 }
 0x57f   : > { %p1099_p7 = pnand %p1098_p4, %p1246_p5 }
 0x580   : > { %p1104_p11 = por %p1103_p10, %p1102_p9 }
 0x581   : > { %p1100_p8 = pneg %p1099_p7 }
 0x582   : > { %p1106_p13 = por %p1105_p12, %p1104_p11 }
 0x584   : > { %p1107_p0 = pnand %p1106_p13, %p1100_p8 }
 0x586   : > { %1110 = shalt.err (!%p1107_p0)
}
 0x587   : > { %1035 = dma.vmem_to_hbm [thread:$0]  (%p1246_p5), %s1324_s30, 128, %s1322_s11, %s856_s12  }
 0x588 PF: > { %p1041_p1 = scmp.ge.s32.totalorder %s1145_s16, 2  ;;  %s881_s25 = sand.u32 1, %s1133_s13  }
 0x589   : > { %s882_s21 = scalar_lea.sflag [#allocation3], %s881_s25 }
 0x58a   : > { %p1038_p2 = pnand %p1041_p1, %p1250_p6 }
 0x58c   : > { %1128 = dma.done.wait (!%p1038_p2), %s882_s21, 128  }
 0x58d   : > { %1130 = vsyncadd (!%p1038_p2), %s882_s21, 4294967168  ;;  %p20_p3 = scmp.ge.s32.totalorder %s1233_s19, 4   ;;  %s1377_s13 = smov %s1137_s14 }
 0x58e   : > { %s1378_s14 = smov %s1141_s15  ;;  %s1379_s15 = smov %s1244_s22 }
 0x58f   : > { %s1380_s16 = smov %s1233_s19  ;;  %22 = sbr.rel (!%p20_p3) target bundleno = 3 (0x3), region = 104 }
 0x596   :  { %887 = vsyncpa [#allocation3], 1 }
 0x597   :  { %889 = vsyncpa [#allocation3 + $0x1], 1 }

</bundles_post_ra>
